<compile_context>
chip_gen: v6e
topology: v6e:2x2x1
jax: 0.10.0
libtpu: 0.0.40
codegen_flags: <defaults>
</compile_context>

<pallas_src>
import jax
import jax.numpy as jnp
import numpy as np
from jax.experimental import pallas as pl
from jax.experimental.pallas import tpu as pltpu


def _round_up(a: int, m: int) -> int:
    return ((a + m - 1) // m) * m


# ---------------------------------------------------------------------------
# Kernel: one MXU matmul + tanh + one FMA per batch tile.
# ---------------------------------------------------------------------------
def _phys_out_norm_kernel(x_ref, w_ref, vec_ref, o_ref):
    # vec_ref rows: 0 = folded bias (x_mean @ W + b_h), 1 = scale, 2 = bias
    z = jnp.dot(x_ref[...], w_ref[...], preferred_element_type=jnp.float32)
    z = z + vec_ref[0:1, :]
    o_ref[...] = jnp.tanh(z) * vec_ref[1:2, :] + vec_ref[2:3, :]


# ---------------------------------------------------------------------------
# One-time parameter prep (host-side constant folding).
# ---------------------------------------------------------------------------
def prepare_params(theta_h, w_h, b_h, x_mean, x_std, y_mean, y_std):
    w_h = jnp.asarray(w_h, jnp.float32)
    n_x, n_y = w_h.shape
    x_mean = jnp.asarray(x_mean, jnp.float32).reshape(1, n_x)
    x_std = jnp.asarray(x_std, jnp.float32).reshape(1, n_x)
    theta_h = jnp.asarray(theta_h, jnp.float32).reshape(1, n_y)
    b_h = jnp.asarray(b_h, jnp.float32).reshape(1, n_y)
    y_mean = jnp.asarray(y_mean, jnp.float32).reshape(1, n_y)
    y_std = jnp.asarray(y_std, jnp.float32).reshape(1, n_y)

    # Fold the input z-score denormalization into the weights (exact algebra):
    w_fold = x_std.reshape(n_x, 1) * w_h                 # (n_x, n_y)
    b_fold = x_mean @ w_h + b_h                          # (1, n_y)
    # Fold theta_h scaling and the output z-score normalization:
    scale = theta_h / y_std                              # (1, n_y)
    bias = -y_mean / y_std                               # (1, n_y)

    vec = jnp.concatenate([b_fold, scale, bias], axis=0)  # (3, n_y)
    return w_fold, vec


# ---------------------------------------------------------------------------
# Forward: exactly one pallas_call, no pad/slice around it.
# ---------------------------------------------------------------------------
def physical_output_normalized(x_norm, w_fold, vec, *, block_b=1024):
    x_norm = jnp.asarray(x_norm, jnp.float32)
    B, n_x = x_norm.shape
    n_y = w_fold.shape[1]

    # Batch tile: multiple of 8 sublanes; ragged boundary handled by Pallas.
    tb = block_b if B > block_b else _round_up(B, 8)
    grid = (pl.cdiv(B, tb),)

    const2d = lambda shape: pl.BlockSpec(shape, lambda i: (0, 0))

    return pl.pallas_call(
        _phys_out_norm_kernel,
        out_shape=jax.ShapeDtypeStruct((B, n_y), jnp.float32),
        grid=grid,
        in_specs=[
            pl.BlockSpec((tb, n_x), lambda i: (i, 0)),   # x_norm (batch tiled)
            const2d((n_x, n_y)),                         # folded weights
            const2d((3, n_y)),                           # [b_fold; scale; bias]
        ],
        out_specs=pl.BlockSpec((tb, n_y), lambda i: (i, 0)),
        compiler_params=pltpu.CompilerParams(
            dimension_semantics=("parallel",),
            vmem_limit_bytes=32 * 1024 * 1024,
        ),
    )(x_norm, w_fold, vec)


# ---------------------------------------------------------------------------
# Pure-JAX reference mirroring the PyTorch forward (unfused) for validation.
# ---------------------------------------------------------------------------
def reference_forward(x_norm, theta_h, w_h, b_h, x_mean, x_std, y_mean, y_std):
    x_denorm = x_norm * x_std + x_mean                     # zscore_denormalize
    # TODO(synk): h_physical is user-supplied in the reference module; realized
    # here as a theta-scaled tanh-linear map (same realization as the kernel).
    y_denorm = theta_h * jnp.tanh(
        jnp.dot(x_denorm, w_h, precision=jax.lax.Precision.HIGHEST,
                preferred_element_type=jnp.float32) + b_h)
    return (y_denorm - y_mean) / y_std                     # zscore_normalize


if __name__ == "__main__":
    B, n_x, n_y = 16, 32, 8

    key = jax.random.PRNGKey(0)
    kx, kt, kw, kb, kxm, kxs, kym, kys = jax.random.split(key, 8)

    x_norm = jax.random.normal(kx, (B, n_x), jnp.float32)
    theta_h = jax.random.uniform(kt, (1, n_y), jnp.float32, 0.5, 1.5)
    w_h = (0.3 * jax.random.normal(kw, (n_x, n_y))).astype(jnp.float32)
    b_h = (0.1 * jax.random.normal(kb, (1, n_y))).astype(jnp.float32)
    x_mean = (0.5 * jax.random.normal(kxm, (1, n_x))).astype(jnp.float32)
    x_std = jax.random.uniform(kxs, (1, n_x), jnp.float32, 0.5, 1.5)
    y_mean = (0.5 * jax.random.normal(kym, (1, n_y))).astype(jnp.float32)
    y_std = jax.random.uniform(kys, (1, n_y), jnp.float32, 0.5, 1.5)

    # One-time parameter prep (constant folding), then a single pallas_call.
    w_fold, vec = prepare_params(theta_h, w_h, b_h, x_mean, x_std, y_mean, y_std)
    w_fold, vec = jax.block_until_ready((w_fold, vec))

    y = physical_output_normalized(x_norm, w_fold, vec)
    y = jax.block_until_ready(y)

    y_ref = reference_forward(x_norm, theta_h, w_h, b_h,
                              x_mean, x_std, y_mean, y_std)

    assert y.shape == (B, n_y), y.shape
    np.testing.assert_allclose(np.asarray(y), np.asarray(y_ref),
                               rtol=1e-4, atol=1e-4)

    print("KERNEL_OK")
</pallas_src>

<mosaic_0001>
module attributes {stable_mosaic.version = 11 : i64} {
  func.func @_phys_out_norm_kernel(%arg0: i32, %arg1: memref<16x32xf32, #tpu.memory_space<vmem>>, %arg2: memref<32x8xf32, #tpu.memory_space<vmem>>, %arg3: memref<3x8xf32, #tpu.memory_space<vmem>>, %arg4: memref<16x8xf32, #tpu.memory_space<vmem>>) attributes {dimension_semantics = [#tpu.dimension_semantics<parallel>], iteration_bounds = array<i64: 1>, scalar_prefetch = 0 : i64, scratch_operands = 0 : i64, tpu.core_type = #tpu.core_type<tc>, window_params = [{transform_indices = @transform_0, window_bounds = array<i64: 16, 32>}, {pipeline_mode = #tpu.pipeline_mode<synchronous>, transform_indices = @transform_1, window_bounds = array<i64: 32, 8>}, {pipeline_mode = #tpu.pipeline_mode<synchronous>, transform_indices = @transform_2, window_bounds = array<i64: 3, 8>}, {transform_indices = @transform_3, window_bounds = array<i64: 16, 8>}]} {
    %c0 = arith.constant 0 : index
    %c0_0 = arith.constant 0 : index
    %0 = vector.load %arg1[%c0, %c0_0] : memref<16x32xf32, #tpu.memory_space<vmem>>, vector<16x32xf32>
    %c0_1 = arith.constant 0 : index
    %c0_2 = arith.constant 0 : index
    %1 = vector.load %arg2[%c0_1, %c0_2] : memref<32x8xf32, #tpu.memory_space<vmem>>, vector<32x8xf32>
    %cst = arith.constant dense<0.000000e+00> : vector<16x8xf32>
    %2 = tpu.matmul %0, %1, %cst {dimension_numbers = #tpu.dot_dimension_numbers<[1], [0], [0], [1], [0, 0, 1, 1], [], []>} : vector<16x32xf32>, vector<32x8xf32>, vector<16x8xf32> -> vector<16x8xf32>
    %c0_3 = arith.constant 0 : index
    %c0_4 = arith.constant 0 : index
    %3 = vector.load %arg3[%c0_3, %c0_4] : memref<3x8xf32, #tpu.memory_space<vmem>>, vector<1x8xf32>
    %4 = vector.broadcast %3 : vector<1x8xf32> to vector<16x8xf32>
    %5 = arith.addf %2, %4 : vector<16x8xf32>
    %6 = math.tanh %5 : vector<16x8xf32>
    %c1 = arith.constant 1 : index
    %c0_5 = arith.constant 0 : index
    %7 = vector.load %arg3[%c1, %c0_5] : memref<3x8xf32, #tpu.memory_space<vmem>>, vector<1x8xf32>
    %8 = vector.broadcast %7 : vector<1x8xf32> to vector<16x8xf32>
    %9 = arith.mulf %6, %8 : vector<16x8xf32>
    %c2 = arith.constant 2 : index
    %c0_6 = arith.constant 0 : index
    %10 = vector.load %arg3[%c2, %c0_6] : memref<3x8xf32, #tpu.memory_space<vmem>>, vector<1x8xf32>
    %11 = vector.broadcast %10 : vector<1x8xf32> to vector<16x8xf32>
    %12 = arith.addf %9, %11 : vector<16x8xf32>
    %c0_7 = arith.constant 0 : index
    %c0_8 = arith.constant 0 : index
    %13 = vector.load %arg4[%c0_7, %c0_8] : memref<16x8xf32, #tpu.memory_space<vmem>>, vector<16x8xf32>
    tpu.vector_store %arg4[%c0_7, %c0_8], %12 {strides = array<i32>} : memref<16x8xf32, #tpu.memory_space<vmem>>, vector<16x8xf32>,
    return
  }
  func.func @transform_0(%arg0: i32) -> (i32, i32) {
    %c0_i32 = arith.constant 0 : i32
    %c0_i32_0 = arith.constant 0 : i32
    return %arg0, %c0_i32 : i32, i32
  }
  func.func @transform_1(%arg0: i32) -> (i32, i32) {
    %c0_i32 = arith.constant 0 : i32
    %c0_i32_0 = arith.constant 0 : i32
    %c0_i32_1 = arith.constant 0 : i32
    return %c0_i32, %c0_i32_0 : i32, i32
  }
  func.func @transform_2(%arg0: i32) -> (i32, i32) {
    %c0_i32 = arith.constant 0 : i32
    %c0_i32_0 = arith.constant 0 : i32
    %c0_i32_1 = arith.constant 0 : i32
    return %c0_i32, %c0_i32_0 : i32, i32
  }
  func.func @transform_3(%arg0: i32) -> (i32, i32) {
    %c0_i32 = arith.constant 0 : i32
    %c0_i32_0 = arith.constant 0 : i32
    return %arg0, %c0_i32 : i32, i32
  }
}

</mosaic_0001>

<bundles_post_ra>
// kernel: tpu_custom_call.1
= control target key start
LH: loop header
LB: loop body
LE: loop exit
PB: predicated region body
PF: predicated region fallthrough
CT: control target
= control target key end

     0   :  { %vm25_vm0 = vcmask 261120   ;;  %vm123_vm1 = vcmask 64512   ;;  %s211_s1 = inlined_call_operand.vmem [shape: f32[32,8], index: 1, kind: input, shape index: {}]   ;;  %s212_s0 = inlined_call_operand.vmem [shape: f32[16,32], index: 0, kind: input, shape index: {}]   ;;  %s213_s2 = inlined_call_operand.vmem [shape: f32[3,8], index: 2, kind: input, shape index: {}]   ;;  %s214_s3 = inlined_call_operand.vmem [shape: f32[16,8], index: 3, kind: output, shape index: {}]  }
   0x1   :  { %v19_v0 = vld [vmem:[%s211_s1 + $0x18] sm:$0xff]  ;;  %v18_v1 = vld [vmem:[%s211_s1 + $0x10] sm:$0xff]  ;;  %v14_v2 = vld [vmem:[%s212_s0] sm:$0xff] }
   0x2   :  { %141 = vmatprep.subr.mxu0 %v19_v0  ;;  %v17_v3 = vld [vmem:[%s211_s1 + $0x8] sm:$0xff]  ;;  %149 = vmatprep.mubr.msk.f32.mxu0 %vm25_vm0, %v14_v2  ;;  %v16_v4 = vld [vmem:[%s211_s1] sm:$0xff] }
   0x3   :  { %142 = vmatpush3.msra.mxu0 %v19_v0  ;;  %v15_v5 = vld [vmem:[%s212_s0 + $0x8] sm:$0xff]  ;;  %v130_v6 = vld [vmem:[%s213_s2] ss:$0 sm:$0xff]  ;;  %v133_v11 = vld [vmem:[%s213_s2 + $0x1] ss:$0 sm:$0xff] }
   0x4   :  { %143 = vmatprep.subr.mxu0 %v18_v1  ;;  %v134_v13 = vld [vmem:[%s213_s2 + $0x2] ss:$0 sm:$0xff] }
   0x5   :  { %144 = vmatpush3.msra.mxu0 %v18_v1 }
   0x6   :  { %145 = vmatprep.subr.mxu0 %v17_v3 }
   0x7   :  { %146 = vmatpush3.msra.mxu0 %v17_v3 }
   0x8   :  { %147 = vmatprep.subr.mxu0 %v16_v4 }
   0x9   :  { %148 = vmatpush3.msra.mxu0 %v16_v4 }
   0xa   :  { %150 = vmatmul.mubr.msk.f32.vlgmr.msra.gmra.mxu0 %vm25_vm0, %v15_v5 }
  0xca   :  { %v151_v7 = vpop.f32.mrf.mxu0 }
  0xcb   :  { %v104_v8 = vadd.f32 %v151_v7, %v130_v6 }
  0xcc   :  { %v98_v9 = vpop.f32.mrf.mxu0 }
  0xcd   :  { %152 = vtanh.f32 %v104_v8  ;;  %v99_v10 = vadd.f32 %v130_v6, %v98_v9 }
  0xcf   :  { %154 = vtanh.f32 %v99_v10 }
  0xda   :  { %v153_v12 = vpop.eup %152 }
  0xdb   :  { %v115_v14 = vmul.f32 %v153_v12, %v133_v11 }
  0xdc   :  { %v155_v15 = vpop.eup %154 }
  0xdd   :  { %v122_v16 = vadd.f32 %v134_v13, %v115_v14  ;;  %v114_v17 = vmul.f32 %v155_v15, %v133_v11 }
  0xdf   :  { %125 = vst.msk [vmem:[%s214_s3 + $0x8] sm:$0xff] %vm123_vm1, %v122_v16  ;;  %v121_v18 = vadd.f32 %v134_v13, %v114_v17 }
  0xe1   :  { %124 = vst.msk [vmem:[%s214_s3] sm:$0xff] %vm123_vm1, %v121_v18 }

</bundles_post_ra>
